<compile_context>
chip_gen: v7x
topology: tpu7x:2x2x1
jax: 0.10.0
libtpu: 0.0.40
codegen_flags: <defaults>
</compile_context>

<pallas_src>
import jax
import jax.numpy as jnp
from jax.experimental import pallas as pl
from jax.experimental.pallas import tpu as pltpu


def _two_linear_kernel(w1_ref, b1_ref, w2_ref, x_ref, o_ref):
    # w1_ref : (C_hid, C_in)        f32, SMEM  (PyTorch convention: out x in)
    # b1_ref : (C_hid,)             f32, SMEM
    # w2_ref : (C_out, C_hid)       f32, SMEM
    # x_ref  : (C_in,  R_TILE, 128) f32, VMEM  (sublane/lane-dense activations)
    # o_ref  : (C_out, R_TILE, 128) f32, VMEM
    c_in = x_ref.shape[0]
    c_hid = w1_ref.shape[0]
    c_out = w2_ref.shape[0]

    # Dense (R_TILE, 128) slabs, one per input channel.
    xs = [x_ref[c, :, :] for c in range(c_in)]

    # Layer 1 (VPU FMAs, no MXU):  h[j] = b1[j] + sum_c W1[j, c] * x[c]
    hs = []
    for j in range(c_hid):
        h = xs[0] * w1_ref[j, 0]
        for c in range(1, c_in):
            h = h + xs[c] * w1_ref[j, c]
        hs.append(h + b1_ref[j])

    # Layer 2 (no bias), stored per output channel (no concatenate/shuffle).
    for k in range(c_out):
        o = hs[0] * w2_ref[k, 0]
        for j in range(1, c_hid):
            o = o + hs[j] * w2_ref[k, j]
        o_ref[k, :, :] = o


def model_forward(x1, w1, b1, w2):
    """x1: (B, C, S) float32.  Returns (B, S, C_out), matching the PyTorch module."""
    B, C, S = x1.shape
    c_out = w2.shape[0]
    rows = B * S

    LANE = 128
    SUB = 8

    # Lane-major activations: X[c, b*S + s] = x1[b, c, s]  (absorbs permute(0,2,1)).
    x_t = jnp.transpose(x1, (1, 0, 2)).reshape(C, rows)

    # Pad only up to the next 128 multiple (<= 127 extra columns), then repack to
    # the sublane/lane-dense 3-D layout (C, N, 128).
    rows128 = ((rows + LANE - 1) // LANE) * LANE
    if rows128 != rows:
        x_t = jnp.pad(x_t, ((0, 0), (0, rows128 - rows)))
    n = rows128 // LANE
    x3 = x_t.reshape(C, n, LANE)

    # Row-group tile (multiple of 8 sublanes).  Target MiB-scale payload per grid
    # step, keep >= 2 steps when possible (v7x has 2 TensorCores), and stay well
    # inside the 32 MiB scoped-VMEM budget with double buffering.
    MAX_R_TILE = 2048  # 3*2048*128*4B = 3 MiB in + 3 MiB out per step
    if n <= SUB:
        r_tile = n  # block dim equals full array dim -> always legal
    else:
        half = -(-n // 2)
        r_tile = min(MAX_R_TILE, ((half + SUB - 1) // SUB) * SUB)
    grid = (pl.cdiv(n, r_tile),)

    out3 = pl.pallas_call(
        _two_linear_kernel,
        out_shape=jax.ShapeDtypeStruct((c_out, n, LANE), jnp.float32),
        grid_spec=pltpu.PrefetchScalarGridSpec(
            num_scalar_prefetch=0,
            grid=grid,
            in_specs=[
                pl.BlockSpec(memory_space=pltpu.MemorySpace.SMEM),      # W1
                pl.BlockSpec(memory_space=pltpu.MemorySpace.SMEM),      # b1
                pl.BlockSpec(memory_space=pltpu.MemorySpace.SMEM),      # W2
                pl.BlockSpec((C, r_tile, LANE), lambda i: (0, i, 0)),   # X tile
            ],
            out_specs=pl.BlockSpec((c_out, r_tile, LANE), lambda i: (0, i, 0)),
        ),
        compiler_params=pltpu.CompilerParams(
            dimension_semantics=("parallel",),
            vmem_limit_bytes=32 * 1024 * 1024,
        ),
    )(w1, b1, w2, x3)

    out_t = out3.reshape(c_out, rows128)[:, :rows]
    return jnp.transpose(out_t.reshape(c_out, B, S), (1, 2, 0))


def _reference(x1, w1, b1, w2):
    v1 = jnp.transpose(x1, (0, 2, 1))
    return (v1 @ w1.T + b1) @ w2.T


if __name__ == "__main__":
    key = jax.random.PRNGKey(0)
    k_x, k_w1, k_b1, k_w2, k_big, k_rag = jax.random.split(key, 6)

    # Parameters mimicking nn.Linear(3, 3): uniform(-1/sqrt(3), 1/sqrt(3)).
    bound = 1.0 / jnp.sqrt(3.0)
    w1 = jax.random.uniform(k_w1, (3, 3), jnp.float32, -bound, bound)
    b1 = jax.random.uniform(k_b1, (3,), jnp.float32, -bound, bound)
    w2 = jax.random.uniform(k_w2, (3, 3), jnp.float32, -bound, bound)

    # 1) Spec-sized input: torch.randn(1, 3, 3)  ->  single grid step.
    x1 = jax.random.normal(k_x, (1, 3, 3), dtype=jnp.float32)
    out = model_forward(x1, w1, b1, w2)
    jax.block_until_ready(out)
    assert out.shape == (1, 3, 3)
    assert jnp.allclose(out, _reference(x1, w1, b1, w2), atol=1e-5, rtol=1e-5)

    # 2) Large batch: rows = 64000 (multiple of 128) -> 2 grid steps, ragged last block.
    x_big = jax.random.normal(k_big, (64, 3, 1000), dtype=jnp.float32)
    out_big = model_forward(x_big, w1, b1, w2)
    jax.block_until_ready(out_big)
    assert out_big.shape == (64, 1000, 3)
    assert jnp.allclose(out_big, _reference(x_big, w1, b1, w2), atol=1e-5, rtol=1e-5)

    # 3) Ragged rows (185 -> padded to 256) exercising the lane-pad + slice path.
    x_rag = jax.random.normal(k_rag, (5, 3, 37), dtype=jnp.float32)
    out_rag = model_forward(x_rag, w1, b1, w2)
    jax.block_until_ready(out_rag)
    assert out_rag.shape == (5, 37, 3)
    assert jnp.allclose(out_rag, _reference(x_rag, w1, b1, w2), atol=1e-5, rtol=1e-5)

    print("KERNEL_OK")
</pallas_src>

<mosaic_0001>
module attributes {stable_mosaic.version = 11 : i64} {
  func.func @_two_linear_kernel(%arg0: i32, %arg1: memref<3x3xf32, #tpu.memory_space<smem>>, %arg2: memref<3xf32, #tpu.memory_space<smem>>, %arg3: memref<3x3xf32, #tpu.memory_space<smem>>, %arg4: memref<3x1x128xf32, #tpu.memory_space<vmem>>, %arg5: memref<3x1x128xf32, #tpu.memory_space<vmem>>) attributes {dimension_semantics = [#tpu.dimension_semantics<parallel>], iteration_bounds = array<i64: 1>, scalar_prefetch = 0 : i64, scratch_operands = 0 : i64, tpu.core_type = #tpu.core_type<tc>, window_params = [{transform_indices = @transform_0, window_bounds = array<i64: 3, 3>}, {transform_indices = @transform_1, window_bounds = array<i64: 3>}, {transform_indices = @transform_2, window_bounds = array<i64: 3, 3>}, {transform_indices = @transform_3, window_bounds = array<i64: 3, 1, 128>}, {transform_indices = @transform_4, window_bounds = array<i64: 3, 1, 128>}]} {
    %c0 = arith.constant 0 : index
    %c0_0 = arith.constant 0 : index
    %c0_1 = arith.constant 0 : index
    %0 = vector.load %arg4[%c0, %c0_0, %c0_1] : memref<3x1x128xf32, #tpu.memory_space<vmem>>, vector<1x1x128xf32>
    %1 = vector.shape_cast %0 : vector<1x1x128xf32> to vector<1x128xf32>
    %c1 = arith.constant 1 : index
    %c0_2 = arith.constant 0 : index
    %c0_3 = arith.constant 0 : index
    %2 = vector.load %arg4[%c1, %c0_2, %c0_3] : memref<3x1x128xf32, #tpu.memory_space<vmem>>, vector<1x1x128xf32>
    %3 = vector.shape_cast %2 : vector<1x1x128xf32> to vector<1x128xf32>
    %c2 = arith.constant 2 : index
    %c0_4 = arith.constant 0 : index
    %c0_5 = arith.constant 0 : index
    %4 = vector.load %arg4[%c2, %c0_4, %c0_5] : memref<3x1x128xf32, #tpu.memory_space<vmem>>, vector<1x1x128xf32>
    %5 = vector.shape_cast %4 : vector<1x1x128xf32> to vector<1x128xf32>
    %c0_6 = arith.constant 0 : index
    %c0_7 = arith.constant 0 : index
    %6 = memref.load %arg1[%c0_6, %c0_7] : memref<3x3xf32, #tpu.memory_space<smem>>
    %7 = vector.broadcast %6 : f32 to vector<1x128xf32>
    %8 = arith.mulf %1, %7 : vector<1x128xf32>
    %c0_8 = arith.constant 0 : index
    %c1_9 = arith.constant 1 : index
    %9 = memref.load %arg1[%c0_8, %c1_9] : memref<3x3xf32, #tpu.memory_space<smem>>
    %10 = vector.broadcast %9 : f32 to vector<1x128xf32>
    %11 = arith.mulf %3, %10 : vector<1x128xf32>
    %12 = arith.addf %8, %11 : vector<1x128xf32>
    %c0_10 = arith.constant 0 : index
    %c2_11 = arith.constant 2 : index
    %13 = memref.load %arg1[%c0_10, %c2_11] : memref<3x3xf32, #tpu.memory_space<smem>>
    %14 = vector.broadcast %13 : f32 to vector<1x128xf32>
    %15 = arith.mulf %5, %14 : vector<1x128xf32>
    %16 = arith.addf %12, %15 : vector<1x128xf32>
    %c0_12 = arith.constant 0 : index
    %17 = memref.load %arg2[%c0_12] : memref<3xf32, #tpu.memory_space<smem>>
    %18 = vector.broadcast %17 : f32 to vector<1x128xf32>
    %19 = arith.addf %16, %18 : vector<1x128xf32>
    %c1_13 = arith.constant 1 : index
    %c0_14 = arith.constant 0 : index
    %20 = memref.load %arg1[%c1_13, %c0_14] : memref<3x3xf32, #tpu.memory_space<smem>>
    %21 = vector.broadcast %20 : f32 to vector<1x128xf32>
    %22 = arith.mulf %1, %21 : vector<1x128xf32>
    %c1_15 = arith.constant 1 : index
    %c1_16 = arith.constant 1 : index
    %23 = memref.load %arg1[%c1_15, %c1_16] : memref<3x3xf32, #tpu.memory_space<smem>>
    %24 = vector.broadcast %23 : f32 to vector<1x128xf32>
    %25 = arith.mulf %3, %24 : vector<1x128xf32>
    %26 = arith.addf %22, %25 : vector<1x128xf32>
    %c1_17 = arith.constant 1 : index
    %c2_18 = arith.constant 2 : index
    %27 = memref.load %arg1[%c1_17, %c2_18] : memref<3x3xf32, #tpu.memory_space<smem>>
    %28 = vector.broadcast %27 : f32 to vector<1x128xf32>
    %29 = arith.mulf %5, %28 : vector<1x128xf32>
    %30 = arith.addf %26, %29 : vector<1x128xf32>
    %c1_19 = arith.constant 1 : index
    %31 = memref.load %arg2[%c1_19] : memref<3xf32, #tpu.memory_space<smem>>
    %32 = vector.broadcast %31 : f32 to vector<1x128xf32>
    %33 = arith.addf %30, %32 : vector<1x128xf32>
    %c2_20 = arith.constant 2 : index
    %c0_21 = arith.constant 0 : index
    %34 = memref.load %arg1[%c2_20, %c0_21] : memref<3x3xf32, #tpu.memory_space<smem>>
    %35 = vector.broadcast %34 : f32 to vector<1x128xf32>
    %36 = arith.mulf %1, %35 : vector<1x128xf32>
    %c2_22 = arith.constant 2 : index
    %c1_23 = arith.constant 1 : index
    %37 = memref.load %arg1[%c2_22, %c1_23] : memref<3x3xf32, #tpu.memory_space<smem>>
    %38 = vector.broadcast %37 : f32 to vector<1x128xf32>
    %39 = arith.mulf %3, %38 : vector<1x128xf32>
    %40 = arith.addf %36, %39 : vector<1x128xf32>
    %c2_24 = arith.constant 2 : index
    %c2_25 = arith.constant 2 : index
    %41 = memref.load %arg1[%c2_24, %c2_25] : memref<3x3xf32, #tpu.memory_space<smem>>
    %42 = vector.broadcast %41 : f32 to vector<1x128xf32>
    %43 = arith.mulf %5, %42 : vector<1x128xf32>
    %44 = arith.addf %40, %43 : vector<1x128xf32>
    %c2_26 = arith.constant 2 : index
    %45 = memref.load %arg2[%c2_26] : memref<3xf32, #tpu.memory_space<smem>>
    %46 = vector.broadcast %45 : f32 to vector<1x128xf32>
    %47 = arith.addf %44, %46 : vector<1x128xf32>
    %c0_27 = arith.constant 0 : index
    %c0_28 = arith.constant 0 : index
    %48 = memref.load %arg3[%c0_27, %c0_28] : memref<3x3xf32, #tpu.memory_space<smem>>
    %49 = vector.broadcast %48 : f32 to vector<1x128xf32>
    %50 = arith.mulf %19, %49 : vector<1x128xf32>
    %c0_29 = arith.constant 0 : index
    %c1_30 = arith.constant 1 : index
    %51 = memref.load %arg3[%c0_29, %c1_30] : memref<3x3xf32, #tpu.memory_space<smem>>
    %52 = vector.broadcast %51 : f32 to vector<1x128xf32>
    %53 = arith.mulf %33, %52 : vector<1x128xf32>
    %54 = arith.addf %50, %53 : vector<1x128xf32>
    %c0_31 = arith.constant 0 : index
    %c2_32 = arith.constant 2 : index
    %55 = memref.load %arg3[%c0_31, %c2_32] : memref<3x3xf32, #tpu.memory_space<smem>>
    %56 = vector.broadcast %55 : f32 to vector<1x128xf32>
    %57 = arith.mulf %47, %56 : vector<1x128xf32>
    %58 = arith.addf %54, %57 : vector<1x128xf32>
    %c0_33 = arith.constant 0 : index
    %c0_34 = arith.constant 0 : index
    %c0_35 = arith.constant 0 : index
    %59 = vector.load %arg5[%c0_33, %c0_34, %c0_35] : memref<3x1x128xf32, #tpu.memory_space<vmem>>, vector<1x1x128xf32>
    %60 = vector.shape_cast %59 : vector<1x1x128xf32> to vector<1x128xf32>
    %61 = vector.shape_cast %58 : vector<1x128xf32> to vector<1x1x128xf32>
    tpu.vector_store %arg5[%c0_33, %c0_34, %c0_35], %61 {strides = array<i32>} : memref<3x1x128xf32, #tpu.memory_space<vmem>>, vector<1x1x128xf32>,
    %c1_36 = arith.constant 1 : index
    %c0_37 = arith.constant 0 : index
    %62 = memref.load %arg3[%c1_36, %c0_37] : memref<3x3xf32, #tpu.memory_space<smem>>
    %63 = vector.broadcast %62 : f32 to vector<1x128xf32>
    %64 = arith.mulf %19, %63 : vector<1x128xf32>
    %c1_38 = arith.constant 1 : index
    %c1_39 = arith.constant 1 : index
    %65 = memref.load %arg3[%c1_38, %c1_39] : memref<3x3xf32, #tpu.memory_space<smem>>
    %66 = vector.broadcast %65 : f32 to vector<1x128xf32>
    %67 = arith.mulf %33, %66 : vector<1x128xf32>
    %68 = arith.addf %64, %67 : vector<1x128xf32>
    %c1_40 = arith.constant 1 : index
    %c2_41 = arith.constant 2 : index
    %69 = memref.load %arg3[%c1_40, %c2_41] : memref<3x3xf32, #tpu.memory_space<smem>>
    %70 = vector.broadcast %69 : f32 to vector<1x128xf32>
    %71 = arith.mulf %47, %70 : vector<1x128xf32>
    %72 = arith.addf %68, %71 : vector<1x128xf32>
    %c1_42 = arith.constant 1 : index
    %c0_43 = arith.constant 0 : index
    %c0_44 = arith.constant 0 : index
    %73 = vector.load %arg5[%c1_42, %c0_43, %c0_44] : memref<3x1x128xf32, #tpu.memory_space<vmem>>, vector<1x1x128xf32>
    %74 = vector.shape_cast %73 : vector<1x1x128xf32> to vector<1x128xf32>
    %75 = vector.shape_cast %72 : vector<1x128xf32> to vector<1x1x128xf32>
    tpu.vector_store %arg5[%c1_42, %c0_43, %c0_44], %75 {strides = array<i32>} : memref<3x1x128xf32, #tpu.memory_space<vmem>>, vector<1x1x128xf32>,
    %c2_45 = arith.constant 2 : index
    %c0_46 = arith.constant 0 : index
    %76 = memref.load %arg3[%c2_45, %c0_46] : memref<3x3xf32, #tpu.memory_space<smem>>
    %77 = vector.broadcast %76 : f32 to vector<1x128xf32>
    %78 = arith.mulf %19, %77 : vector<1x128xf32>
    %c2_47 = arith.constant 2 : index
    %c1_48 = arith.constant 1 : index
    %79 = memref.load %arg3[%c2_47, %c1_48] : memref<3x3xf32, #tpu.memory_space<smem>>
    %80 = vector.broadcast %79 : f32 to vector<1x128xf32>
    %81 = arith.mulf %33, %80 : vector<1x128xf32>
    %82 = arith.addf %78, %81 : vector<1x128xf32>
    %c2_49 = arith.constant 2 : index
    %c2_50 = arith.constant 2 : index
    %83 = memref.load %arg3[%c2_49, %c2_50] : memref<3x3xf32, #tpu.memory_space<smem>>
    %84 = vector.broadcast %83 : f32 to vector<1x128xf32>
    %85 = arith.mulf %47, %84 : vector<1x128xf32>
    %86 = arith.addf %82, %85 : vector<1x128xf32>
    %c2_51 = arith.constant 2 : index
    %c0_52 = arith.constant 0 : index
    %c0_53 = arith.constant 0 : index
    %87 = vector.load %arg5[%c2_51, %c0_52, %c0_53] : memref<3x1x128xf32, #tpu.memory_space<vmem>>, vector<1x1x128xf32>
    %88 = vector.shape_cast %87 : vector<1x1x128xf32> to vector<1x128xf32>
    %89 = vector.shape_cast %86 : vector<1x128xf32> to vector<1x1x128xf32>
    tpu.vector_store %arg5[%c2_51, %c0_52, %c0_53], %89 {strides = array<i32>} : memref<3x1x128xf32, #tpu.memory_space<vmem>>, vector<1x1x128xf32>,
    return
  }
  func.func @transform_0(%arg0: i32) -> (i32, i32) {
    %c0_i32 = arith.constant 0 : i32
    %c0_i32_0 = arith.constant 0 : i32
    %c0_i32_1 = arith.constant 0 : i32
    return %c0_i32, %c0_i32_0 : i32, i32
  }
  func.func @transform_1(%arg0: i32) -> i32 {
    %c0_i32 = arith.constant 0 : i32
    %c0_i32_0 = arith.constant 0 : i32
    return %c0_i32 : i32
  }
  func.func @transform_2(%arg0: i32) -> (i32, i32) {
    %c0_i32 = arith.constant 0 : i32
    %c0_i32_0 = arith.constant 0 : i32
    %c0_i32_1 = arith.constant 0 : i32
    return %c0_i32, %c0_i32_0 : i32, i32
  }
  func.func @transform_3(%arg0: i32) -> (i32, i32, i32) {
    %c0_i32 = arith.constant 0 : i32
    %c0_i32_0 = arith.constant 0 : i32
    %c0_i32_1 = arith.constant 0 : i32
    return %c0_i32, %arg0, %c0_i32_0 : i32, i32, i32
  }
  func.func @transform_4(%arg0: i32) -> (i32, i32, i32) {
    %c0_i32 = arith.constant 0 : i32
    %c0_i32_0 = arith.constant 0 : i32
    %c0_i32_1 = arith.constant 0 : i32
    return %c0_i32, %arg0, %c0_i32_0 : i32, i32, i32
  }
}

</mosaic_0001>

<bundles_post_ra>
// kernel: tpu_custom_call.1
= control target key start
LH: loop header
LB: loop body
LE: loop exit
PB: predicated region body
PF: predicated region fallthrough
CT: control target
= control target key end

     0   :  { %9 = vsyncpa [#allocation4], 0  ;;  %s367_s0 = inlined_call_operand.hbm [shape: f32[3,3], index: 0, kind: input, shape index: {}]   ;;  %s368_s1 = inlined_call_operand.hbm [shape: f32[3], index: 1, kind: input, shape index: {}]   ;;  %s369_s2 = inlined_call_operand.vmem [shape: f32[3,3], index: 2, kind: input, shape index: {}]   ;;  %s370_s3 = inlined_call_operand.vmem [shape: f32[3,1,128], index: 3, kind: input, shape index: {}]   ;;  %s371_s4 = inlined_call_operand.hbm [shape: f32[3,1,128], index: 4, kind: output, shape index: {}]  }
   0x1   :  { %10 = vsyncpa [#allocation7], 0 }
   0x2   :  { %11 = vsyncpa [#allocation5], 0 }
   0x3   :  { %12 = vsyncpa [#allocation3], 0  ;;  %s181_s17 = scalar_lea.hbm %s367_s0, 64 }
   0x4   :  { %p182_p0 = scmp.ne.s32.totalorder %s367_s0, %s181_s17  ;;  %p185_p1 = scmp.lt.u32.totalorder %s181_s17, %s367_s0 }
   0x6   :  { %p187_p2 = pnand %p185_p1, %p182_p0 }
   0x8   :  { %190 = shalt.err (!%p187_p2)
}
   0x9   :  { %s243_s22 = smov [#allocation2]   ;;  %s191_s27 = scalar_lea.hbm %s368_s1, 16 }
   0xa   :  { %20 = dma.hbm_to_smem %s367_s0, 64, %s243_s22, [#allocation4]  }
   0xb   :  { %p192_p3 = scmp.ne.s32.totalorder %s368_s1, %s191_s27  ;;  %p195_p4 = scmp.lt.u32.totalorder %s191_s27, %s368_s1 }
   0xd   :  { %p197_p5 = pnand %p195_p4, %p192_p3 }
   0xf   :  { %200 = shalt.err (!%p197_p5)
}
  0x10   :  { %s244_s6 = smov [#allocation6]   ;;  %s35_s10 = sshll.u32 %s369_s2, 4  ;;  %s36_s10 = int_to_ptr.vmem [resolvable:$true] %s35_s10 }
  0x11   :  { %28 = dma.hbm_to_smem %s368_s1, 16, %s244_s6, [#allocation7]  }
  0x12   :  { %s201_s11 = scalar_lea.vmem %s36_s10, 64  ;;  %p206_p7 = scmp.lt.s32.totalorder %s36_s10, %s36_s10 }
  0x13   :  { %p202_p6 = scmp.ne.s32.totalorder %s36_s10, %s201_s11  ;;  %p207_p8 = scmp.lt.s32.totalorder %s201_s11, %s201_s11 }
  0x15   :  { %p208_p9 = por %p207_p8, %p206_p7 }
  0x17   :  { %p209_p10 = pnand %p208_p9, %p202_p6 }
  0x19   :  { %212 = shalt.err (!%p209_p10)
}
  0x1a   :  { %s245_s12 = smov [#allocation8]  }
  0x1b   :  { %38 = dma.vmem_to_smem %s36_s10, 64, %s245_s12, [#allocation5]  }
  0x1c   :  { %235 = dma.done.wait [#allocation4], 64  }
  0x1d   :  { %236 = vsyncadd [#allocation4], 4294967232 }
  0x1e   :  { %237 = dma.done.wait [#allocation7], 16  }
  0x1f   :  { %238 = vsyncadd [#allocation7], 4294967280 }
  0x20   :  { %239 = dma.done.wait [#allocation5], 64  }
  0x21   :  { %240 = vsyncadd [#allocation5], 4294967232 }
  0x22   :  { %50 = sfence }
  0x23   :  { %s56_s1 = sld [smem:[#allocation2]]  ;;  %s157_s13 = sld [smem:[#allocation2 + $0x1]]  ;;  %v51_v0 = vld [vmem:[%s370_s3] sm:$0x1]  ;;  %v155_v1 = vld [vmem:[%s370_s3 + $0x1] sm:$0x1] }
  0x24   :  { %s158_s2 = sld [smem:[#allocation2 + $0x2]]  ;;  %s301_s14 = sld [smem:[#allocation6]]  ;;  %v156_v2 = vld [vmem:[%s370_s3 + $0x2] sm:$0x1] }
  0x25   :  { %s159_s15 = sld [smem:[#allocation2 + $0x80]]  ;;  %s160_s16 = sld [smem:[#allocation2 + $0x81]] }
  0x26   :  { %s161_s19 = sld [smem:[#allocation2 + $0x82]]  ;;  %s306_s20 = sld [smem:[#allocation6 + $0x1]] }
  0x27   :  { %s311_s23 = sld [smem:[#allocation2 + $0x100]]  ;;  %s313_s24 = sld [smem:[#allocation2 + $0x101]] }
  0x28   :  { %s318_s27 = sld [smem:[#allocation2 + $0x102]]  ;;  %s322_s29 = sld [smem:[#allocation8]] }
  0x29   :  { %s320_s28 = sld [smem:[#allocation6 + $0x2]]  ;;  %v57_v3 = vstv %s56_s1  ;;  %v60_v4 = vstv %s157_s13  ;;  %s324_s30 = sld [smem:[#allocation8 + $0x1]] }
  0x2a   :  { %v58_v5 = vmul.f32 %v57_v3, %v51_v0  ;;  %v61_v6 = vmul.f32 %v155_v1, %v60_v4  ;;  %v64_v7 = vstv %s158_s2  ;;  %s326_s5 = sld [smem:[#allocation8 + $0x2]]  ;;  %s328_s6 = sld [smem:[#allocation8 + $0x80]]  ;;  %v68_v15 = vstv %s301_s14 }
  0x2b   :  { %v65_v8 = vmul.f32 %v156_v2, %v64_v7  ;;  %v71_v9 = vstv %s159_s15  ;;  %v74_v10 = vstv %s160_s16  ;;  %s330_s3 = sld [smem:[#allocation8 + $0x81]]  ;;  %s332_s7 = sld [smem:[#allocation8 + $0x82]] }
  0x2c   :  { %v62_v11 = vadd.f32 %v61_v6, %v58_v5  ;;  %v72_v12 = vmul.f32 %v71_v9, %v51_v0  ;;  %v75_v13 = vmul.f32 %v155_v1, %v74_v10  ;;  %v78_v14 = vstv %s161_s19  ;;  %s334_s8 = sld [smem:[#allocation8 + $0x100]]  ;;  %s336_s0 = sld [smem:[#allocation8 + $0x101]] }
  0x2d   :  { %v79_v16 = vmul.f32 %v156_v2, %v78_v14  ;;  %v85_v17 = vstv %s311_s23  ;;  %v88_v18 = vstv %s313_s24  ;;  %s341_s9 = sld [smem:[#allocation8 + $0x102]]  ;;  %v82_v23 = vstv %s306_s20  ;;  %s246_s10 = smov [#allocation9]  }
  0x2e   :  { %v66_v19 = vadd.f32 %v65_v8, %v62_v11  ;;  %v76_v20 = vadd.f32 %v75_v13, %v72_v12  ;;  %v86_v21 = vmul.f32 %v85_v17, %v51_v0  ;;  %v89_v22 = vmul.f32 %v155_v1, %v88_v18  ;;  %s141_s11 = sshll.u32 %s246_s10, 4  ;;  %s142_s11 = int_to_ptr.vmem [resolvable:$true] %s141_s11 }
  0x2f   :  { %v92_v24 = vstv %s318_s27  ;;  %v96_v25 = vstv %s320_s28  ;;  %v99_v26 = vstv %s322_s29  ;;  %v102_v31 = vstv %s324_s30  ;;  %s213_s12 = scalar_lea.vmem %s142_s11, 48  ;;  %s217_s1 = scalar_lea.vmem %s142_s11, 64 }
  0x30   :  { %v69_v27 = vadd.f32 %v68_v15, %v66_v19  ;;  %v80_v28 = vadd.f32 %v79_v16, %v76_v20  ;;  %v90_v29 = vadd.f32 %v89_v22, %v86_v21  ;;  %v93_v30 = vmul.f32 %v156_v2, %v92_v24  ;;  %p214_p11 = scmp.ne.s32.totalorder %s142_s11, %s213_s12  ;;  %p218_p12 = scmp.lt.s32.totalorder %s142_s11, %s142_s11 }
  0x31   :  { %v106_v32 = vstv %s326_s5  ;;  %v111_v33 = vstv %s328_s6  ;;  %v114_v34 = vstv %s330_s3  ;;  %v118_v39 = vstv %s332_s7  ;;  %p219_p13 = scmp.lt.s32.totalorder %s217_s1, %s213_s12 }
  0x32   :  { %v83_v35 = vadd.f32 %v82_v23, %v80_v28  ;;  %v94_v36 = vadd.f32 %v93_v30, %v90_v29  ;;  %v100_v37 = vmul.f32 %v99_v26, %v69_v27  ;;  %v112_v38 = vmul.f32 %v111_v33, %v69_v27 }
  0x33   :  { %v124_v40 = vstv %s334_s8  ;;  %v127_v41 = vstv %s336_s0  ;;  %v131_v42 = vstv %s341_s9  ;;  %p220_p0 = por %p219_p13, %p218_p12 }
  0x34   :  { %v97_v43 = vadd.f32 %v96_v25, %v94_v36  ;;  %v103_v44 = vmul.f32 %v102_v31, %v83_v35  ;;  %v115_v45 = vmul.f32 %v114_v34, %v83_v35  ;;  %v125_v46 = vmul.f32 %v124_v40, %v69_v27 }
  0x35   :  { %v128_v47 = vmul.f32 %v127_v41, %v83_v35  ;;  %p221_p1 = pnand %p220_p0, %p214_p11 }
  0x36   :  { %v104_v48 = vadd.f32 %v103_v44, %v100_v37  ;;  %v107_v49 = vmul.f32 %v106_v32, %v97_v43  ;;  %v116_v50 = vadd.f32 %v115_v45, %v112_v38  ;;  %v119_v51 = vmul.f32 %v118_v39, %v97_v43 }
  0x37   :  { %v129_v52 = vadd.f32 %v128_v47, %v125_v46  ;;  %v132_v53 = vmul.f32 %v131_v42, %v97_v43 }
  0x38   :  { %v108_v54 = vadd.f32 %v107_v49, %v104_v48  ;;  %v120_v55 = vadd.f32 %v119_v51, %v116_v50 }
  0x39   :  { %v133_v56 = vadd.f32 %v132_v53, %v129_v52 }
  0x3a   :  { %109 = vst [vmem:[#allocation9] sm:$0x1] %v108_v54  ;;  %122 = vst [vmem:[#allocation9 + $0x1] sm:$0x1] %v120_v55 }
  0x3b   :  { %135 = vst [vmem:[#allocation9 + $0x2] sm:$0x1] %v133_v56 }
  0x3c   :  { %224 = shalt.err (!%p221_p1)
}
  0x3d   :  { %s225_s14 = scalar_lea.hbm %s371_s4, 48 }
  0x3e   :  { %p226_p2 = scmp.ne.s32.totalorder %s371_s4, %s225_s14  ;;  %p229_p3 = scmp.lt.u32.totalorder %s225_s14, %s371_s4 }
  0x40   :  { %p231_p4 = pnand %p229_p3, %p226_p2 }
  0x42   :  { %234 = shalt.err (!%p231_p4)
}
  0x43   :  { %s247_s19 = smov 16   ;;  %s248_s20 = smov 1  }
  0x44   :  { %147 = dma.vmem_to_hbm [thread:$0]  %s142_s11, 48, %s371_s4, [#allocation3], %s247_s19, %s247_s19, %s248_s20  }
  0x45   :  { %241 = dma.done.wait [#allocation3], 48  }
  0x46   :  { %242 = vsyncadd [#allocation3], 4294967248 }
  0x47   :  { %151 = vsyncpa [#allocation3], 1 }
  0x48   :  { %152 = vsyncpa [#allocation4], 1 }
  0x49   :  { %153 = vsyncpa [#allocation7], 1 }
  0x4a   :  { %154 = vsyncpa [#allocation5], 1 }

</bundles_post_ra>
